<compile_context>
chip_gen: v6e
topology: v6e:2x2x1
jax: 0.10.0
libtpu: 0.0.40
codegen_flags: <defaults>
</compile_context>

<pallas_src>
import functools

import jax
import jax.numpy as jnp
from jax.experimental import pallas as pl
from jax.experimental.pallas import tpu as pltpu


_SMALL_PATH_MAX_NPAD = 512    # fused single-kernel path for graphs up to this
_LARGE_ROW_TILE = 512         # rows per A_hat block on the tiled path


@functools.lru_cache(maxsize=None)
def _vmem_limit_bytes():
    """Generation-aware scoped-VMEM limit (96 MiB v5e/v6e, 48 MiB v7x)."""
    default = 32 * 1024 * 1024
    try:
        cap = getattr(pltpu.get_tpu_info(), "vmem_capacity_bytes", None)
        if not cap:
            return default
        return int(min(96 * 1024 * 1024, max(default, (cap * 3) // 4)))
    except Exception:
        return default


# ----------------------------------------------------------------------------
# Kernel bodies
# ----------------------------------------------------------------------------
def _fused_small_kernel(adj_ref, x_ref, onehot_ref, invc_ref,
                        w1_ref, b1_ref, w2_ref, b2_ref,
                        wc1_ref, bc1_ref, wc2_ref, bc2_ref, o_ref):
    """Whole forward in one kernel (everything resident in VMEM)."""
    bf16 = jnp.bfloat16
    adj = adj_ref[...]

    xw1 = jnp.dot(x_ref[...], w1_ref[...], preferred_element_type=jnp.float32)
    h1 = jnp.maximum(
        jnp.dot(adj, xw1.astype(bf16), preferred_element_type=jnp.float32)
        + b1_ref[...], 0.0)
    xw2 = jnp.dot(h1.astype(bf16), w2_ref[...],
                  preferred_element_type=jnp.float32)
    h2 = (jnp.dot(adj, xw2.astype(bf16), preferred_element_type=jnp.float32)
          + b2_ref[...])

    # global mean pool + classifier, all in f32 (tiny).
    g = jnp.dot(onehot_ref[...], h2,
                preferred_element_type=jnp.float32) * invc_ref[...]
    c1 = jnp.maximum(
        jnp.dot(g, wc1_ref[...], preferred_element_type=jnp.float32)
        + bc1_ref[...], 0.0)
    o_ref[...] = (jnp.dot(c1, wc2_ref[...], preferred_element_type=jnp.float32)
                  + bc2_ref[...])


def _linear_kernel(x_ref, w_ref, o_ref):
    """Row tile of x @ W (W resident, constant block)."""
    o_ref[...] = jnp.dot(x_ref[...], w_ref[...],
                         preferred_element_type=jnp.float32).astype(o_ref.dtype)


def _propagate_kernel(*refs, relu, fuse_next, xw_resident, kblk):
    """One (row-tile, k-tile) step of  act(A_hat @ xw + b) [@ W_next]."""
    if fuse_next:
        adj_ref, xw_ref, b_ref, wnext_ref, o_ref, acc_ref = refs
    else:
        adj_ref, xw_ref, b_ref, o_ref, acc_ref = refs
        wnext_ref = None

    k = pl.program_id(1)

    @pl.when(k == 0)
    def _():
        acc_ref[...] = jnp.zeros_like(acc_ref)

    if xw_resident:
        # xw is a single constant (n_pad, h_pad) block; slice the K chunk.
        start = pl.multiple_of(k * kblk, kblk)
        xw = xw_ref[pl.ds(start, kblk), :]
    else:
        xw = xw_ref[...]

    acc_ref[...] += jnp.dot(adj_ref[...], xw,
                            preferred_element_type=jnp.float32)

    @pl.when(k == pl.num_programs(1) - 1)
    def _():
        h = acc_ref[...] + b_ref[...]          # f32 bias add / ReLU on the VPU
        if relu:
            h = jnp.maximum(h, 0.0)
        if fuse_next:
            # Fused next-layer feature transform: rides the MXU slack.
            h = jnp.dot(h.astype(jnp.bfloat16), wnext_ref[...],
                        preferred_element_type=jnp.float32)
        o_ref[...] = h.astype(o_ref.dtype)


def _pool_classifier_kernel(onehot_ref, invc_ref, h2_ref,
                            wc1_ref, bc1_ref, wc2_ref, bc2_ref,
                            o_ref, acc_ref):
    """Segment-sum over node tiles; mean + classifier (f32) in the epilogue."""
    k = pl.program_id(0)

    @pl.when(k == 0)
    def _():
        acc_ref[...] = jnp.zeros_like(acc_ref)

    acc_ref[...] += jnp.dot(onehot_ref[...], h2_ref[...].astype(jnp.float32),
                            preferred_element_type=jnp.float32)

    @pl.when(k == pl.num_programs(0) - 1)
    def _():
        g = acc_ref[...] * invc_ref[...]                       # mean pool (f32)
        c1 = jnp.maximum(
            jnp.dot(g, wc1_ref[...], preferred_element_type=jnp.float32)
            + bc1_ref[...], 0.0)
        o_ref[...] = (jnp.dot(c1, wc2_ref[...],
                              preferred_element_type=jnp.float32)
                      + bc2_ref[...])


# ----------------------------------------------------------------------------
# pallas_call wrappers
# ----------------------------------------------------------------------------
def _fused_small(adj_p, x_p, onehot, inv_counts,
                 w1, b1, w2, b2, wc1, bc1, wc2, bc2):
    g_pad = onehot.shape[0]
    o_pad = wc2.shape[1]
    args = (adj_p, x_p, onehot, inv_counts, w1, b1, w2, b2, wc1, bc1, wc2, bc2)
    return pl.pallas_call(
        _fused_small_kernel,
        out_shape=jax.ShapeDtypeStruct((g_pad, o_pad), jnp.float32),
        grid=(1,),
        in_specs=[pl.BlockSpec(a.shape, lambda i: (0, 0)) for a in args],
        out_specs=pl.BlockSpec((g_pad, o_pad), lambda i: (0, 0)),
        compiler_params=pltpu.CompilerParams(
            dimension_semantics=("arbitrary",),
            vmem_limit_bytes=_vmem_limit_bytes()),
    )(*args)


def _linear(x, w, tile):
    n_pad, f_pad = x.shape
    h_pad = w.shape[1]
    return pl.pallas_call(
        _linear_kernel,
        out_shape=jax.ShapeDtypeStruct((n_pad, h_pad), jnp.bfloat16),
        grid=(n_pad // tile,),
        in_specs=[pl.BlockSpec((tile, f_pad), lambda i: (i, 0)),
                  pl.BlockSpec((f_pad, h_pad), lambda i: (0, 0))],
        out_specs=pl.BlockSpec((tile, h_pad), lambda i: (i, 0)),
        compiler_params=pltpu.CompilerParams(
            dimension_semantics=("parallel",),
            vmem_limit_bytes=_vmem_limit_bytes()),
    )(x, w)


def _propagate(adj_p, xw, b, w_next, *, row_tile, kblk, relu, xw_resident):
    """out = act(A_hat @ xw + b) [@ w_next], rows tiled, K reduction-last."""
    n_pad = adj_p.shape[0]
    h_pad = xw.shape[1]
    fuse_next = w_next is not None
    out_h = w_next.shape[1] if fuse_next else h_pad

    # Rectangular A_hat block (row_tile x kblk); xw either resident (one
    # constant block, DMA'd once) or streamed per K tile.
    in_specs = [pl.BlockSpec((row_tile, kblk), lambda i, k: (i, k))]
    if xw_resident:
        in_specs.append(pl.BlockSpec((n_pad, h_pad), lambda i, k: (0, 0)))
    else:
        in_specs.append(pl.BlockSpec((kblk, h_pad), lambda i, k: (k, 0)))
    in_specs.append(pl.BlockSpec((1, h_pad), lambda i, k: (0, 0)))    # bias
    args = [adj_p, xw, b]
    if fuse_next:
        in_specs.append(pl.BlockSpec((h_pad, out_h), lambda i, k: (0, 0)))
        args.append(w_next)

    kernel = functools.partial(_propagate_kernel, relu=relu,
                               fuse_next=fuse_next,
                               xw_resident=xw_resident, kblk=kblk)
    return pl.pallas_call(
        kernel,
        out_shape=jax.ShapeDtypeStruct((n_pad, out_h), jnp.bfloat16),
        grid=(n_pad // row_tile, n_pad // kblk),        # (rows, reduction-last)
        in_specs=in_specs,
        out_specs=pl.BlockSpec((row_tile, out_h), lambda i, k: (i, 0)),
        scratch_shapes=[pltpu.VMEM((row_tile, h_pad), jnp.float32)],
        compiler_params=pltpu.CompilerParams(
            dimension_semantics=("parallel", "arbitrary"),
            vmem_limit_bytes=_vmem_limit_bytes()),
    )(*args)


def _pool_classify(onehot, inv_counts, h2, wc1, bc1, wc2, bc2, tile):
    g_pad, n_pad = onehot.shape
    h_pad = h2.shape[1]
    half_pad = wc1.shape[1]
    o_pad = wc2.shape[1]
    return pl.pallas_call(
        _pool_classifier_kernel,
        out_shape=jax.ShapeDtypeStruct((g_pad, o_pad), jnp.float32),
        grid=(n_pad // tile,),
        in_specs=[pl.BlockSpec((g_pad, tile), lambda k: (0, k)),     # one-hot
                  pl.BlockSpec((g_pad, 1), lambda k: (0, 0)),        # 1/counts
                  pl.BlockSpec((tile, h_pad), lambda k: (k, 0)),     # h2 tile
                  pl.BlockSpec((h_pad, half_pad), lambda k: (0, 0)),
                  pl.BlockSpec((1, half_pad), lambda k: (0, 0)),
                  pl.BlockSpec((half_pad, o_pad), lambda k: (0, 0)),
                  pl.BlockSpec((1, o_pad), lambda k: (0, 0))],
        out_specs=pl.BlockSpec((g_pad, o_pad), lambda k: (0, 0)),
        scratch_shapes=[pltpu.VMEM((g_pad, h_pad), jnp.float32)],
        compiler_params=pltpu.CompilerParams(
            dimension_semantics=("arbitrary",),
            vmem_limit_bytes=_vmem_limit_bytes()),
    )(onehot, inv_counts, h2, wc1, bc1, wc2, bc2)


# ----------------------------------------------------------------------------
# Padding / glue helpers
# ----------------------------------------------------------------------------
def _round_up(x, m):
    return ((x + m - 1) // m) * m


def _pad2d(a, rows, cols):
    return jnp.pad(a, ((0, rows - a.shape[0]), (0, cols - a.shape[1])))


def node_padding(num_nodes):
    n128 = _round_up(num_nodes, 128)
    if n128 <= _SMALL_PATH_MAX_NPAD:
        return n128
    return _round_up(num_nodes, _LARGE_ROW_TILE)


def _pick_kblk(n_pad):
    for cand in (2048, 1024, 512):
        if n_pad % cand == 0:
            return cand
    return _LARGE_ROW_TILE


def build_normalized_adjacency(edge_index, num_nodes):
    """A_hat = D^{-1/2}(A + I)D^{-1/2}; A[dst, src] = 1 (src -> dst flow).

    Note: row-sum degree matches PyG GCNConv for symmetric edge_index (true
    for the bidirectional test graphs below); duplicate edges accumulate and
    pre-existing self loops become weight 2, unlike add_remaining_self_loops.
    """
    src, dst = edge_index[0], edge_index[1]
    adj = jnp.zeros((num_nodes, num_nodes), jnp.float32)
    adj = adj.at[dst, src].add(1.0)
    adj = adj + jnp.eye(num_nodes, dtype=jnp.float32)     # self loops
    deg = jnp.sum(adj, axis=1)
    dis = jnp.where(deg > 0, jax.lax.rsqrt(deg), 0.0)
    return dis[:, None] * adj * dis[None, :]


def prepare_adjacency(edge_index, num_nodes):
    """Padded bf16 A_hat, built ONCE per graph (hoisted out of forward)."""
    adj_hat = build_normalized_adjacency(edge_index, num_nodes)
    n_pad = node_padding(num_nodes)
    return _pad2d(adj_hat, n_pad, n_pad).astype(jnp.bfloat16)


def image_gcn_forward(adj_p, x, params, batch, num_graphs):
    """Fused ImageGCN forward pass on TPU via Pallas kernels.

    adj_p: pre-padded bf16 normalized adjacency from prepare_adjacency().
    """
    num_nodes, input_dim = x.shape
    n_pad = adj_p.shape[0]
    hidden_dim = params["w1"].shape[1]
    half_dim = params["wc1"].shape[1]
    out_dim = params["wc2"].shape[1]

    f_pad = _round_up(input_dim, 128)
    h_pad = _round_up(hidden_dim, 128)
    half_pad = _round_up(half_dim, 128)
    o_pad = _round_up(out_dim, 128)          # 102 -> 128: lane-dense stores
    g_pad = _round_up(max(num_graphs, 1), 8)

    bf16, f32 = jnp.bfloat16, jnp.float32

    # Zero-pad (exact semantics); MXU-heavy operands bf16, classifier f32.
    x_p = _pad2d(x, n_pad, f_pad).astype(bf16)
    w1 = _pad2d(params["w1"], f_pad, h_pad).astype(bf16)
    b1 = _pad2d(params["b1"], 1, h_pad).astype(f32)
    w2 = _pad2d(params["w2"], h_pad, h_pad).astype(bf16)
    b2 = _pad2d(params["b2"], 1, h_pad).astype(f32)
    wc1 = _pad2d(params["wc1"], h_pad, half_pad).astype(f32)
    bc1 = _pad2d(params["bc1"], 1, half_pad).astype(f32)
    wc2 = _pad2d(params["wc2"], half_pad, o_pad).astype(f32)
    bc2 = _pad2d(params["bc2"], 1, o_pad).astype(f32)

    # global_mean_pool bookkeeping: exact 0/1 one-hot (f32) + inverse counts.
    batch_p = jnp.full((n_pad,), -1, jnp.int32).at[:num_nodes].set(
        batch.astype(jnp.int32))
    onehot = (batch_p[None, :] ==
              jnp.arange(g_pad, dtype=jnp.int32)[:, None]).astype(f32)
    counts = jnp.sum(onehot, axis=1, keepdims=True)
    inv_counts = jnp.where(counts > 0, 1.0 / counts, 0.0)

    if n_pad <= _SMALL_PATH_MAX_NPAD:
        # Single fused kernel: no intermediate HBM traffic, one launch.
        logits = _fused_small(adj_p, x_p, onehot, inv_counts,
                              w1, b1, w2, b2, wc1, bc1, wc2, bc2)
    else:
        row_tile = _LARGE_ROW_TILE               # >= 2 row tiles -> megacore
        kblk = _pick_kblk(n_pad)                 # rectangular A_hat blocks
        xw_bytes = n_pad * h_pad * 2
        xw_resident = xw_bytes <= _vmem_limit_bytes() // 3

        # xw1 = x @ W1
        xw1 = _linear(x_p, w1, row_tile)
        # layer 1 (+ fused W2):  xw2 = relu(A_hat @ xw1 + b1) @ W2
        xw2 = _propagate(adj_p, xw1, b1, w2, row_tile=row_tile, kblk=kblk,
                         relu=True, xw_resident=xw_resident)
        # layer 2:  h2 = A_hat @ xw2 + b2
        h2 = _propagate(adj_p, xw2, b2, None, row_tile=row_tile, kblk=kblk,
                        relu=False, xw_resident=xw_resident)
        # global mean pool + classifier (f32)
        logits = _pool_classify(onehot, inv_counts, h2,
                                wc1, bc1, wc2, bc2, kblk)

    return logits[:num_graphs, :out_dim]


# ----------------------------------------------------------------------------
# Parameters / pure-JAX reference
# ----------------------------------------------------------------------------
def init_params(key, input_dim, hidden_dim, output_dim=102):
    ks = jax.random.split(key, 4)

    def glorot(k, shape):
        scale = (2.0 / (shape[0] + shape[1])) ** 0.5
        return scale * jax.random.normal(k, shape, jnp.float32)

    half = hidden_dim // 2
    return {
        "w1": glorot(ks[0], (input_dim, hidden_dim)),
        "b1": jnp.zeros((1, hidden_dim), jnp.float32),
        "w2": glorot(ks[1], (hidden_dim, hidden_dim)),
        "b2": jnp.zeros((1, hidden_dim), jnp.float32),
        "wc1": glorot(ks[2], (hidden_dim, half)),
        "bc1": jnp.zeros((1, half), jnp.float32),
        "wc2": glorot(ks[3], (half, output_dim)),
        "bc2": jnp.zeros((1, output_dim), jnp.float32),
    }


def reference_forward(adj_hat, x, params, batch, num_graphs):
    """Pure-JAX f32 reference of the PyTorch forward."""
    h1 = jnp.maximum(adj_hat @ (x @ params["w1"]) + params["b1"], 0.0)
    h2 = adj_hat @ (h1 @ params["w2"]) + params["b2"]
    onehot = (batch[None, :] ==
              jnp.arange(num_graphs)[:, None]).astype(jnp.float32)
    counts = jnp.maximum(jnp.sum(onehot, axis=1, keepdims=True), 1.0)
    g = (onehot @ h2) / counts
    c1 = jnp.maximum(g @ params["wc1"] + params["bc1"], 0.0)
    return c1 @ params["wc2"] + params["bc2"]


def _chain_graph(num_graphs, nodes_per_graph):
    srcs, dsts = [], []
    for g in range(num_graphs):
        base = g * nodes_per_graph
        for i in range(nodes_per_graph - 1):
            srcs += [base + i, base + i + 1]
            dsts += [base + i + 1, base + i]
    edge_index = jnp.array([srcs, dsts], dtype=jnp.int32)
    batch = jnp.repeat(jnp.arange(num_graphs, dtype=jnp.int32),
                       nodes_per_graph)
    return edge_index, batch


def _run_case(key, num_graphs, nodes_per_graph, input_dim, hidden_dim,
              output_dim, fwd):
    k_x, k_p = jax.random.split(key)
    num_nodes = num_graphs * nodes_per_graph
    x = jax.random.normal(k_x, (num_nodes, input_dim), jnp.float32)
    edge_index, batch = _chain_graph(num_graphs, nodes_per_graph)
    params = init_params(k_p, input_dim, hidden_dim, output_dim)

    adj_p = prepare_adjacency(edge_index, num_nodes)     # built once, hoisted
    out = jax.block_until_ready(fwd(adj_p, x, params, batch, num_graphs))

    adj_ref = build_normalized_adjacency(edge_index, num_nodes)
    ref = reference_forward(adj_ref, x, params, batch, num_graphs)
    assert out.shape == (num_graphs, output_dim)
    assert jnp.allclose(out, ref, atol=5e-2, rtol=5e-2), "mismatch vs reference"


if __name__ == "__main__":
    key = jax.random.PRNGKey(0)
    k_small, k_large = jax.random.split(key)

    fwd = jax.jit(image_gcn_forward, static_argnums=(4,))

    # Case A (fused small path): 2 graphs x 8 nodes, F_in=8, H=32, 102 classes.
    _run_case(k_small, num_graphs=2, nodes_per_graph=8,
              input_dim=8, hidden_dim=32, output_dim=102, fwd=fwd)

    # Case B (tiled large path): 2 graphs x 750 nodes exercises the
    # rectangular-block propagate, resident xw, fused W2 and pooled classifier.
    _run_case(k_large, num_graphs=2, nodes_per_graph=750,
              input_dim=8, hidden_dim=32, output_dim=102, fwd=fwd)

    print("KERNEL_OK")
</pallas_src>

<mosaic_0001>
module attributes {stable_mosaic.version = 11 : i64} {
  func.func @_fused_small_kernel(%arg0: i32, %arg1: memref<128x128xbf16, #tpu.memory_space<vmem>>, %arg2: memref<128x128xbf16, #tpu.memory_space<vmem>>, %arg3: memref<8x128xf32, #tpu.memory_space<vmem>>, %arg4: memref<8x1xf32, #tpu.memory_space<vmem>>, %arg5: memref<128x128xbf16, #tpu.memory_space<vmem>>, %arg6: memref<1x128xf32, #tpu.memory_space<vmem>>, %arg7: memref<128x128xbf16, #tpu.memory_space<vmem>>, %arg8: memref<1x128xf32, #tpu.memory_space<vmem>>, %arg9: memref<128x128xf32, #tpu.memory_space<vmem>>, %arg10: memref<1x128xf32, #tpu.memory_space<vmem>>, %arg11: memref<128x128xf32, #tpu.memory_space<vmem>>, %arg12: memref<1x128xf32, #tpu.memory_space<vmem>>, %arg13: memref<8x128xf32, #tpu.memory_space<vmem>>) attributes {dimension_semantics = [#tpu.dimension_semantics<arbitrary>], iteration_bounds = array<i64: 1>, scalar_prefetch = 0 : i64, scratch_operands = 0 : i64, tpu.core_type = #tpu.core_type<tc>, window_params = [{pipeline_mode = #tpu.pipeline_mode<synchronous>, transform_indices = @transform_0, window_bounds = array<i64: 128, 128>}, {pipeline_mode = #tpu.pipeline_mode<synchronous>, transform_indices = @transform_1, window_bounds = array<i64: 128, 128>}, {pipeline_mode = #tpu.pipeline_mode<synchronous>, transform_indices = @transform_2, window_bounds = array<i64: 8, 128>}, {pipeline_mode = #tpu.pipeline_mode<synchronous>, transform_indices = @transform_3, window_bounds = array<i64: 8, 1>}, {pipeline_mode = #tpu.pipeline_mode<synchronous>, transform_indices = @transform_4, window_bounds = array<i64: 128, 128>}, {pipeline_mode = #tpu.pipeline_mode<synchronous>, transform_indices = @transform_5, window_bounds = array<i64: 1, 128>}, {pipeline_mode = #tpu.pipeline_mode<synchronous>, transform_indices = @transform_6, window_bounds = array<i64: 128, 128>}, {pipeline_mode = #tpu.pipeline_mode<synchronous>, transform_indices = @transform_7, window_bounds = array<i64: 1, 128>}, {pipeline_mode = #tpu.pipeline_mode<synchronous>, transform_indices = @transform_8, window_bounds = array<i64: 128, 128>}, {pipeline_mode = #tpu.pipeline_mode<synchronous>, transform_indices = @transform_9, window_bounds = array<i64: 1, 128>}, {pipeline_mode = #tpu.pipeline_mode<synchronous>, transform_indices = @transform_10, window_bounds = array<i64: 128, 128>}, {pipeline_mode = #tpu.pipeline_mode<synchronous>, transform_indices = @transform_11, window_bounds = array<i64: 1, 128>}, {pipeline_mode = #tpu.pipeline_mode<synchronous>, transform_indices = @transform_12, window_bounds = array<i64: 8, 128>}]} {
    %c0 = arith.constant 0 : index
    %c0_0 = arith.constant 0 : index
    %0 = vector.load %arg1[%c0, %c0_0] : memref<128x128xbf16, #tpu.memory_space<vmem>>, vector<128x128xbf16>
    %c0_1 = arith.constant 0 : index
    %c0_2 = arith.constant 0 : index
    %1 = vector.load %arg2[%c0_1, %c0_2] : memref<128x128xbf16, #tpu.memory_space<vmem>>, vector<128x128xbf16>
    %c0_3 = arith.constant 0 : index
    %c0_4 = arith.constant 0 : index
    %2 = vector.load %arg5[%c0_3, %c0_4] : memref<128x128xbf16, #tpu.memory_space<vmem>>, vector<128x128xbf16>
    %cst = arith.constant dense<0.000000e+00> : vector<128x128xf32>
    %3 = tpu.matmul %1, %2, %cst {dimension_numbers = #tpu.dot_dimension_numbers<[1], [0], [0], [1], [0, 0, 1, 1], [], []>} : vector<128x128xbf16>, vector<128x128xbf16>, vector<128x128xf32> -> vector<128x128xf32>
    %4 = arith.truncf %3 : vector<128x128xf32> to vector<128x128xbf16>
    %cst_5 = arith.constant dense<0.000000e+00> : vector<128x128xf32>
    %5 = tpu.matmul %0, %4, %cst_5 {dimension_numbers = #tpu.dot_dimension_numbers<[1], [0], [0], [1], [0, 0, 1, 1], [], []>} : vector<128x128xbf16>, vector<128x128xbf16>, vector<128x128xf32> -> vector<128x128xf32>
    %c0_6 = arith.constant 0 : index
    %c0_7 = arith.constant 0 : index
    %6 = vector.load %arg6[%c0_6, %c0_7] : memref<1x128xf32, #tpu.memory_space<vmem>>, vector<1x128xf32>
    %7 = vector.broadcast %6 : vector<1x128xf32> to vector<128x128xf32>
    %8 = arith.addf %5, %7 : vector<128x128xf32>
    %cst_8 = arith.constant 0.000000e+00 : f32
    %9 = vector.broadcast %cst_8 : f32 to vector<128x128xf32>
    %10 = arith.maximumf %8, %9 : vector<128x128xf32>
    %11 = arith.truncf %10 : vector<128x128xf32> to vector<128x128xbf16>
    %c0_9 = arith.constant 0 : index
    %c0_10 = arith.constant 0 : index
    %12 = vector.load %arg7[%c0_9, %c0_10] : memref<128x128xbf16, #tpu.memory_space<vmem>>, vector<128x128xbf16>
    %cst_11 = arith.constant dense<0.000000e+00> : vector<128x128xf32>
    %13 = tpu.matmul %11, %12, %cst_11 {dimension_numbers = #tpu.dot_dimension_numbers<[1], [0], [0], [1], [0, 0, 1, 1], [], []>} : vector<128x128xbf16>, vector<128x128xbf16>, vector<128x128xf32> -> vector<128x128xf32>
    %14 = arith.truncf %13 : vector<128x128xf32> to vector<128x128xbf16>
    %cst_12 = arith.constant dense<0.000000e+00> : vector<128x128xf32>
    %15 = tpu.matmul %0, %14, %cst_12 {dimension_numbers = #tpu.dot_dimension_numbers<[1], [0], [0], [1], [0, 0, 1, 1], [], []>} : vector<128x128xbf16>, vector<128x128xbf16>, vector<128x128xf32> -> vector<128x128xf32>
    %c0_13 = arith.constant 0 : index
    %c0_14 = arith.constant 0 : index
    %16 = vector.load %arg8[%c0_13, %c0_14] : memref<1x128xf32, #tpu.memory_space<vmem>>, vector<1x128xf32>
    %17 = vector.broadcast %16 : vector<1x128xf32> to vector<128x128xf32>
    %18 = arith.addf %15, %17 : vector<128x128xf32>
    %c0_15 = arith.constant 0 : index
    %c0_16 = arith.constant 0 : index
    %19 = vector.load %arg3[%c0_15, %c0_16] : memref<8x128xf32, #tpu.memory_space<vmem>>, vector<8x128xf32>
    %cst_17 = arith.constant dense<0.000000e+00> : vector<8x128xf32>
    %20 = tpu.matmul %19, %18, %cst_17 {dimension_numbers = #tpu.dot_dimension_numbers<[1], [0], [0], [1], [0, 0, 1, 1], [], []>} : vector<8x128xf32>, vector<128x128xf32>, vector<8x128xf32> -> vector<8x128xf32>
    %c0_18 = arith.constant 0 : index
    %c0_19 = arith.constant 0 : index
    %21 = vector.load %arg4[%c0_18, %c0_19] : memref<8x1xf32, #tpu.memory_space<vmem>>, vector<8x1xf32>
    %22 = vector.broadcast %21 : vector<8x1xf32> to vector<8x128xf32>
    %23 = arith.mulf %20, %22 : vector<8x128xf32>
    %c0_20 = arith.constant 0 : index
    %c0_21 = arith.constant 0 : index
    %24 = vector.load %arg9[%c0_20, %c0_21] : memref<128x128xf32, #tpu.memory_space<vmem>>, vector<128x128xf32>
    %cst_22 = arith.constant dense<0.000000e+00> : vector<8x128xf32>
    %25 = tpu.matmul %23, %24, %cst_22 {dimension_numbers = #tpu.dot_dimension_numbers<[1], [0], [0], [1], [0, 0, 1, 1], [], []>} : vector<8x128xf32>, vector<128x128xf32>, vector<8x128xf32> -> vector<8x128xf32>
    %c0_23 = arith.constant 0 : index
    %c0_24 = arith.constant 0 : index
    %26 = vector.load %arg10[%c0_23, %c0_24] : memref<1x128xf32, #tpu.memory_space<vmem>>, vector<1x128xf32>
    %27 = vector.broadcast %26 : vector<1x128xf32> to vector<8x128xf32>
    %28 = arith.addf %25, %27 : vector<8x128xf32>
    %cst_25 = arith.constant 0.000000e+00 : f32
    %29 = vector.broadcast %cst_25 : f32 to vector<8x128xf32>
    %30 = arith.maximumf %28, %29 : vector<8x128xf32>
    %c0_26 = arith.constant 0 : index
    %c0_27 = arith.constant 0 : index
    %31 = vector.load %arg11[%c0_26, %c0_27] : memref<128x128xf32, #tpu.memory_space<vmem>>, vector<128x128xf32>
    %cst_28 = arith.constant dense<0.000000e+00> : vector<8x128xf32>
    %32 = tpu.matmul %30, %31, %cst_28 {dimension_numbers = #tpu.dot_dimension_numbers<[1], [0], [0], [1], [0, 0, 1, 1], [], []>} : vector<8x128xf32>, vector<128x128xf32>, vector<8x128xf32> -> vector<8x128xf32>
    %c0_29 = arith.constant 0 : index
    %c0_30 = arith.constant 0 : index
    %33 = vector.load %arg12[%c0_29, %c0_30] : memref<1x128xf32, #tpu.memory_space<vmem>>, vector<1x128xf32>
    %34 = vector.broadcast %33 : vector<1x128xf32> to vector<8x128xf32>
    %35 = arith.addf %32, %34 : vector<8x128xf32>
    %c0_31 = arith.constant 0 : index
    %c0_32 = arith.constant 0 : index
    %36 = vector.load %arg13[%c0_31, %c0_32] : memref<8x128xf32, #tpu.memory_space<vmem>>, vector<8x128xf32>
    tpu.vector_store %arg13[%c0_31, %c0_32], %35 {strides = array<i32>} : memref<8x128xf32, #tpu.memory_space<vmem>>, vector<8x128xf32>,
    return
  }
  func.func @transform_0(%arg0: i32) -> (i32, i32) {
    %c0_i32 = arith.constant 0 : i32
    %c0_i32_0 = arith.constant 0 : i32
    %c0_i32_1 = arith.constant 0 : i32
    return %c0_i32, %c0_i32_0 : i32, i32
  }
  func.func @transform_1(%arg0: i32) -> (i32, i32) {
    %c0_i32 = arith.constant 0 : i32
    %c0_i32_0 = arith.constant 0 : i32
    %c0_i32_1 = arith.constant 0 : i32
    return %c0_i32, %c0_i32_0 : i32, i32
  }
  func.func @transform_2(%arg0: i32) -> (i32, i32) {
    %c0_i32 = arith.constant 0 : i32
    %c0_i32_0 = arith.constant 0 : i32
    %c0_i32_1 = arith.constant 0 : i32
    return %c0_i32, %c0_i32_0 : i32, i32
  }
  func.func @transform_3(%arg0: i32) -> (i32, i32) {
    %c0_i32 = arith.constant 0 : i32
    %c0_i32_0 = arith.constant 0 : i32
    %c0_i32_1 = arith.constant 0 : i32
    return %c0_i32, %c0_i32_0 : i32, i32
  }
  func.func @transform_4(%arg0: i32) -> (i32, i32) {
    %c0_i32 = arith.constant 0 : i32
    %c0_i32_0 = arith.constant 0 : i32
    %c0_i32_1 = arith.constant 0 : i32
    return %c0_i32, %c0_i32_0 : i32, i32
  }
  func.func @transform_5(%arg0: i32) -> (i32, i32) {
    %c0_i32 = arith.constant 0 : i32
    %c0_i32_0 = arith.constant 0 : i32
    %c0_i32_1 = arith.constant 0 : i32
    return %c0_i32, %c0_i32_0 : i32, i32
  }
  func.func @transform_6(%arg0: i32) -> (i32, i32) {
    %c0_i32 = arith.constant 0 : i32
    %c0_i32_0 = arith.constant 0 : i32
    %c0_i32_1 = arith.constant 0 : i32
    return %c0_i32, %c0_i32_0 : i32, i32
  }
  func.func @transform_7(%arg0: i32) -> (i32, i32) {
    %c0_i32 = arith.constant 0 : i32
    %c0_i32_0 = arith.constant 0 : i32
    %c0_i32_1 = arith.constant 0 : i32
    return %c0_i32, %c0_i32_0 : i32, i32
  }
  func.func @transform_8(%arg0: i32) -> (i32, i32) {
    %c0_i32 = arith.constant 0 : i32
    %c0_i32_0 = arith.constant 0 : i32
    %c0_i32_1 = arith.constant 0 : i32
    return %c0_i32, %c0_i32_0 : i32, i32
  }
  func.func @transform_9(%arg0: i32) -> (i32, i32) {
    %c0_i32 = arith.constant 0 : i32
    %c0_i32_0 = arith.constant 0 : i32
    %c0_i32_1 = arith.constant 0 : i32
    return %c0_i32, %c0_i32_0 : i32, i32
  }
  func.func @transform_10(%arg0: i32) -> (i32, i32) {
    %c0_i32 = arith.constant 0 : i32
    %c0_i32_0 = arith.constant 0 : i32
    %c0_i32_1 = arith.constant 0 : i32
    return %c0_i32, %c0_i32_0 : i32, i32
  }
  func.func @transform_11(%arg0: i32) -> (i32, i32) {
    %c0_i32 = arith.constant 0 : i32
    %c0_i32_0 = arith.constant 0 : i32
    %c0_i32_1 = arith.constant 0 : i32
    return %c0_i32, %c0_i32_0 : i32, i32
  }
  func.func @transform_12(%arg0: i32) -> (i32, i32) {
    %c0_i32 = arith.constant 0 : i32
    %c0_i32_0 = arith.constant 0 : i32
    %c0_i32_1 = arith.constant 0 : i32
    return %c0_i32, %c0_i32_0 : i32, i32
  }
}

</mosaic_0001>

<bundles_post_ra>
// kernel: image_gcn_forward.1
= control target key start
LH: loop header
LB: loop body
LE: loop exit
PB: predicated region body
PF: predicated region fallthrough
CT: control target
= control target key end

     0   :  { %vm1431_vm0 = vmmov 0   ;;  %s1797_s4 = inlined_call_operand.vmem [shape: bf16[128,128], index: 4, kind: input, shape index: {}]   ;;  %s1798_s1 = inlined_call_operand.vmem [shape: bf16[128,128], index: 1, kind: input, shape index: {}]   ;;  %s1799_s0 = inlined_call_operand.vmem [shape: bf16[128,128], index: 0, kind: input, shape index: {}]   ;;  %s1800_s6 = inlined_call_operand.vmem [shape: bf16[128,128], index: 6, kind: input, shape index: {}]   ;;  %s1801_s5 = inlined_call_operand.vmem [shape: f32[1,128], index: 5, kind: input, shape index: {}]   ;;  %s1802_s3 = inlined_call_operand.vmem [shape: f32[8,1], index: 3, kind: input, shape index: {}]   ;;  %s1803_s8 = inlined_call_operand.vmem [shape: f32[128,128], index: 8, kind: input, shape index: {}]   ;;  %s1804_s7 = inlined_call_operand.vmem [shape: f32[1,128], index: 7, kind: input, shape index: {}]   ;;  %s1805_s2 = inlined_call_operand.vmem [shape: f32[8,128], index: 2, kind: input, shape index: {}]   ;;  %s1806_s10 = inlined_call_operand.vmem [shape: f32[128,128], index: 10, kind: input, shape index: {}]   ;;  %s1807_s9 = inlined_call_operand.vmem [shape: f32[1,128], index: 9, kind: input, shape index: {}]   ;;  %s1808_s11 = inlined_call_operand.vmem [shape: f32[1,128], index: 11, kind: input, shape index: {}]   ;;  %s1809_s12 = inlined_call_operand.vmem [shape: f32[8,128], index: 12, kind: output, shape index: {}]  }
   0x1   :  { %v1398_v0 = vld [vmem:[%s1797_s4 + $0x38] sm:$0xff]   ;;  %v1399_v1 = vld [vmem:[%s1797_s4 + $0x30] sm:$0xff]   ;;  %v1400_v2 = vld [vmem:[%s1797_s4 + $0x28] sm:$0xff]  }
   0x2   :  { %1161 = vmatprep.subr.bf16.mxu0 %v1398_v0  ;;  %v1401_v3 = vld [vmem:[%s1797_s4 + $0x20] sm:$0xff]   ;;  %v1402_v5 = vld [vmem:[%s1797_s4 + $0x18] sm:$0xff]   ;;  %v1403_v6 = vld [vmem:[%s1797_s4 + $0x10] sm:$0xff]  }
   0x3   :  { %1162 = vmatpush3.bf16.msra.mxu0 %v1398_v0  ;;  %v1406_v4 = vld [vmem:[%s1798_s1] sm:$0xff]   ;;  %v1404_v7 = vld [vmem:[%s1797_s4 + $0x8] sm:$0xff]   ;;  %v1408_v10 = vld [vmem:[%s1798_s1 + $0x10] sm:$0xff]  }
   0x4   :  { %1163 = vmatprep.subr.bf16.mxu0 %v1399_v1  ;;  %1177 = vmatprep.mubr.bf16.mxu0 %v1406_v4  ;;  %v1405_v8 = vld [vmem:[%s1797_s4] sm:$0xff]   ;;  %v1407_v9 = vld [vmem:[%s1798_s1 + $0x8] sm:$0xff]   ;;  %v1409_v11 = vld [vmem:[%s1798_s1 + $0x18] sm:$0xff]  }
   0x5   :  { %v1410_v12 = vld [vmem:[%s1798_s1 + $0x20] sm:$0xff]   ;;  %v1411_v13 = vld [vmem:[%s1798_s1 + $0x28] sm:$0xff]   ;;  %v1412_v14 = vld [vmem:[%s1798_s1 + $0x30] sm:$0xff]  }
   0x6   :  { %v1413_v15 = vld [vmem:[%s1798_s1 + $0x38] sm:$0xff]   ;;  %v1549_v16 = vld [vmem:[%s1799_s0] sm:$0xff]   ;;  %v1423_v18 = vld [vmem:[%s1800_s6 + $0x30] sm:$0xff]  }
   0x7   :  { %1164 = vmatpush3.bf16.msra.mxu0 %v1399_v1  ;;  %1209 = vmatprep.mubr.bf16.mxu1 %v1549_v16  ;;  %v1422_v17 = vld [vmem:[%s1800_s6 + $0x38] sm:$0xff]   ;;  %v1424_v19 = vld [vmem:[%s1800_s6 + $0x28] sm:$0xff]   ;;  %v1425_v20 = vld [vmem:[%s1800_s6 + $0x20] sm:$0xff]  }
   0x8   :  { %1165 = vmatprep.subr.bf16.mxu0 %v1400_v2  ;;  %v1426_v21 = vld [vmem:[%s1800_s6 + $0x18] sm:$0xff]   ;;  %v1570_v46 = vld [vmem:[%s1799_s0 + $0x8] sm:$0xff]   ;;  %v1575_v47 = vld [vmem:[%s1799_s0 + $0x10] sm:$0xff]  }
   0x9   :  { %v1582_v48 = vld [vmem:[%s1799_s0 + $0x18] sm:$0xff]   ;;  %v1587_v49 = vld [vmem:[%s1799_s0 + $0x20] sm:$0xff]   ;;  %v1594_v50 = vld [vmem:[%s1799_s0 + $0x28] sm:$0xff]  }
   0xa   :  { %v1599_v51 = vld [vmem:[%s1799_s0 + $0x30] sm:$0xff]   ;;  %v1606_v52 = vld [vmem:[%s1799_s0 + $0x38] sm:$0xff]   ;;  %v1428_v54 = vld [vmem:[%s1800_s6 + $0x8] sm:$0xff]  }
   0xb   :  { %1166 = vmatpush3.bf16.msra.mxu0 %v1400_v2  ;;  %v1427_v53 = vld [vmem:[%s1800_s6 + $0x10] sm:$0xff]   ;;  %v1429_v55 = vld [vmem:[%s1800_s6] sm:$0xff]  }
   0xc   :  { %1167 = vmatprep.subr.bf16.mxu0 %v1401_v3  ;;  %v1026_v58 = vld [vmem:[%s1801_s5] ss:$0 sm:$0xff] }
   0xf   :  { %1168 = vmatpush3.bf16.msra.mxu0 %v1401_v3 }
  0x10   :  { %1169 = vmatprep.subr.bf16.mxu0 %v1402_v5 }
  0x13   :  { %1170 = vmatpush3.bf16.msra.mxu0 %v1402_v5 }
  0x14   :  { %1171 = vmatprep.subr.bf16.mxu0 %v1403_v6 }
  0x17   :  { %1172 = vmatpush3.bf16.msra.mxu0 %v1403_v6 }
  0x18   :  { %1173 = vmatprep.subr.bf16.mxu0 %v1404_v7 }
  0x1b   :  { %1174 = vmatpush3.bf16.msra.mxu0 %v1404_v7 }
  0x1c   :  { %1175 = vmatprep.subr.bf16.mxu0 %v1405_v8 }
  0x1f   :  { %1176 = vmatpush3.bf16.msra.mxu0 %v1405_v8 }
  0x20   :  { %1225 = vmatprep.subr.bf16.mxu0 %v1422_v17 }
  0x22   :  { %1178 = vmatmul.mubr.bf16.vlgmr.msra.gmra.mxu0 %v1407_v9 }
  0x23   :  { %1181 = vmatprep.mubr.bf16.mxu0 %v1408_v10  ;;  %1226 = vmatpush3.bf16.msra.mxu0 %v1422_v17 }
  0x24   :  { %1227 = vmatprep.subr.bf16.mxu0 %v1423_v18 }
  0x27   :  { %1228 = vmatpush3.bf16.msra.mxu0 %v1423_v18 }
  0x28   :  { %1229 = vmatprep.subr.bf16.mxu0 %v1424_v19 }
  0x2a   :  { %1182 = vmatmul.mubr.bf16.gmra.mxu0 %v1409_v11 }
  0x2b   :  { %1185 = vmatprep.mubr.bf16.mxu0 %v1410_v12  ;;  %1230 = vmatpush3.bf16.msra.mxu0 %v1424_v19 }
  0x2c   :  { %1231 = vmatprep.subr.bf16.mxu0 %v1425_v20 }
  0x2f   :  { %1232 = vmatpush3.bf16.msra.mxu0 %v1425_v20 }
  0x30   :  { %1233 = vmatprep.subr.bf16.mxu0 %v1426_v21 }
  0x32   :  { %1186 = vmatmul.mubr.bf16.gmra.mxu0 %v1411_v13 }
  0x33   :  { %1189 = vmatprep.mubr.bf16.mxu0 %v1412_v14  ;;  %1234 = vmatpush3.bf16.msra.mxu0 %v1426_v21 }
  0x34   :  { %1235 = vmatprep.subr.bf16.mxu0 %v1427_v53 }
  0x37   :  { %1236 = vmatpush3.bf16.msra.mxu0 %v1427_v53 }
  0x38   :  { %1237 = vmatprep.subr.bf16.mxu0 %v1428_v54 }
  0x3a   :  { %1190 = vmatmul.mubr.bf16.gmra.mxu0 %v1413_v15 }
  0x3b   :  { %1238 = vmatpush3.bf16.msra.mxu0 %v1428_v54 }
  0x3c   :  { %1239 = vmatprep.subr.bf16.mxu0 %v1429_v55 }
  0x3f   :  { %1240 = vmatpush3.bf16.msra.mxu0 %v1429_v55 }
  0xe2   :  { %v1179_v22 = vpop.f32.mrf.mxu0 }
  0xe4   :  { %v220_v23 = vpop.f32.mrf.mxu0 }
  0xe6   :  { %v1180_v24 = vpop.f32.mrf.mxu0 }
  0xe7   :  { %v284_v44 = vpack.c.bf16 %v1180_v24, %v1179_v22 }
  0xe8   :  { %v223_v25 = vpop.f32.mrf.mxu0 }
  0xe9   :  { %v283_v45 = vpack.c.bf16 %v223_v25, %v220_v23 }
  0xea   :  { %v1183_v26 = vpop.f32.mrf.mxu0 }
  0xec   :  { %v236_v27 = vpop.f32.mrf.mxu0 }
  0xee   :  { %v1184_v28 = vpop.f32.mrf.mxu0 }
  0xef   :  { %v286_v42 = vpack.c.bf16 %v1184_v28, %v1183_v26 }
  0xf0   :  { %v239_v29 = vpop.f32.mrf.mxu0 }
  0xf1   :  { %v285_v43 = vpack.c.bf16 %v239_v29, %v236_v27 }
  0xf2   :  { %v1187_v30 = vpop.f32.mrf.mxu0 }
  0xf4   :  { %v252_v31 = vpop.f32.mrf.mxu0 }
  0xf6   :  { %v1188_v32 = vpop.f32.mrf.mxu0 }
  0xf7   :  { %v288_v40 = vpack.c.bf16 %v1188_v32, %v1187_v30 }
  0xf8   :  { %v255_v33 = vpop.f32.mrf.mxu0 }
  0xf9   :  { %v287_v41 = vpack.c.bf16 %v255_v33, %v252_v31 }
  0xfa   :  { %v1191_v34 = vpop.f32.mrf.mxu0 }
  0xfc   :  { %v268_v35 = vpop.f32.mrf.mxu0 }
  0xfe   :  { %v1192_v36 = vpop.f32.mrf.mxu0 }
  0xff   :  { %v290_v37 = vpack.c.bf16 %v1192_v36, %v1191_v34 }
 0x100   :  { %v271_v38 = vpop.f32.mrf.mxu0 }
 0x101   :  { %v289_v39 = vpack.c.bf16 %v271_v38, %v268_v35  ;;  %1193 = vmatprep.subr.bf16.mxu1 %v290_v37 }
 0x102   :  { %1194 = vmatpush3.bf16.msra.mxu1 %v290_v37 }
 0x103   :  { %1195 = vmatprep.subr.bf16.mxu1 %v289_v39 }
 0x106   :  { %1196 = vmatpush3.bf16.msra.mxu1 %v289_v39 }
 0x107   :  { %1197 = vmatprep.subr.bf16.mxu1 %v288_v40 }
 0x10a   :  { %1198 = vmatpush3.bf16.msra.mxu1 %v288_v40 }
 0x10b   :  { %1199 = vmatprep.subr.bf16.mxu1 %v287_v41 }
 0x10e   :  { %1200 = vmatpush3.bf16.msra.mxu1 %v287_v41 }
 0x10f   :  { %1201 = vmatprep.subr.bf16.mxu1 %v286_v42 }
 0x112   :  { %1202 = vmatpush3.bf16.msra.mxu1 %v286_v42 }
 0x113   :  { %1203 = vmatprep.subr.bf16.mxu1 %v285_v43 }
 0x116   :  { %1204 = vmatpush3.bf16.msra.mxu1 %v285_v43 }
 0x117   :  { %1205 = vmatprep.subr.bf16.mxu1 %v284_v44 }
 0x11a   :  { %1206 = vmatpush3.bf16.msra.mxu1 %v284_v44 }
 0x11b   :  { %1207 = vmatprep.subr.bf16.mxu1 %v283_v45 }
 0x11e   :  { %1208 = vmatpush3.bf16.msra.mxu1 %v283_v45 }
 0x121   :  { %1210 = vmatmul.mubr.bf16.vlgmr.msra.gmra.mxu1 %v1570_v46 }
 0x122   :  { %1213 = vmatprep.mubr.bf16.mxu1 %v1575_v47 }
 0x129   :  { %1214 = vmatmul.mubr.bf16.gmra.mxu1 %v1582_v48 }
 0x12a   :  { %1217 = vmatprep.mubr.bf16.mxu1 %v1587_v49 }
 0x131   :  { %1218 = vmatmul.mubr.bf16.gmra.mxu1 %v1594_v50 }
 0x132   :  { %1221 = vmatprep.mubr.bf16.mxu1 %v1599_v51 }
 0x139   :  { %1222 = vmatmul.mubr.bf16.gmra.mxu1 %v1606_v52 }
 0x13a   :  { %1273 = vmatprep.mubr.bf16.mxu1 %v1549_v16 }
 0x1e1   :  { %v1211_v56 = vpop.f32.mrf.mxu1 }
 0x1e2   :  { %v389_v62 = vadd.f32 %v1211_v56, %v1026_v58 }
 0x1e3   :  { %v380_v57 = vpop.f32.mrf.mxu1 }
 0x1e4   :  { %v381_v60 = vadd.f32 %v1026_v58, %v380_v57  ;;  %v445_v5 = vmax.f32 %v389_v62, 0.0 }
 0x1e5   :  { %v1212_v59 = vpop.f32.mrf.mxu1 }
 0x1e6   :  { %v392_v61 = vadd.f32 %v1212_v59, %v1026_v58  ;;  %v443_v3 = vmax.f32 %v381_v60, 0.0 }
 0x1e7   :  { %v383_v63 = vpop.f32.mrf.mxu1 }
 0x1e8   :  { %v384_v0 = vadd.f32 %v1026_v58, %v383_v63  ;;  %v446_v1 = vmax.f32 %v392_v61, 0.0 }
 0x1e9   :  { %v1215_v2 = vpop.f32.mrf.mxu1 }
 0x1ea   :  { %v444_v4 = vmax.f32 %v384_v0, 0.0  ;;  %v460_v8 = vpack.c.bf16 %v446_v1, %v445_v5  ;;  %v405_v12 = vadd.f32 %v1215_v2, %v1026_v58 }
 0x1eb   :  { %v396_v6 = vpop.f32.mrf.mxu1 }
 0x1ec   :  { %v459_v7 = vpack.c.bf16 %v444_v4, %v443_v3  ;;  %v397_v10 = vadd.f32 %v1026_v58, %v396_v6  ;;  %v449_v19 = vmax.f32 %v405_v12, 0.0 }
 0x1ed   :  { %v1216_v9 = vpop.f32.mrf.mxu1 }
 0x1ee   :  { %v408_v11 = vadd.f32 %v1216_v9, %v1026_v58  ;;  %1241 = vmatprep.mubr.bf16.mxu0 %v459_v7  ;;  %v447_v17 = vmax.f32 %v397_v10, 0.0 }
 0x1ef   :  { %v399_v13 = vpop.f32.mrf.mxu1  ;;  %1242 = vmatmul.mubr.bf16.vlgmr.msra.gmra.mxu0 %v460_v8 }
 0x1f0   :  { %v400_v14 = vadd.f32 %v1026_v58, %v399_v13  ;;  %v450_v15 = vmax.f32 %v408_v11, 0.0 }
 0x1f1   :  { %v1219_v16 = vpop.f32.mrf.mxu1 }
 0x1f2   :  { %v448_v18 = vmax.f32 %v400_v14, 0.0  ;;  %v462_v22 = vpack.c.bf16 %v450_v15, %v449_v19  ;;  %v421_v26 = vadd.f32 %v1219_v16, %v1026_v58  ;;  %v1430_v16 = vmov 0.0   ;;  %v826_v19 = vld [vmem:[%s1803_s8 + $0x40] sm:$0xff] }
 0x1f3   :  { %v412_v20 = vpop.f32.mrf.mxu1  ;;  %1289 = vmatprep.subr.mxu0 %v1430_v16 }
 0x1f4   :  { %v461_v21 = vpack.c.bf16 %v448_v18, %v447_v17  ;;  %v413_v24 = vadd.f32 %v1026_v58, %v412_v20  ;;  %v453_v33 = vmax.f32 %v421_v26, 0.0  ;;  %v828_v17 = vld [vmem:[%s1803_s8 + $0x50] sm:$0xff]  ;;  %v827_v18 = vld [vmem:[%s1803_s8 + $0x48] sm:$0xff]  ;;  %v825_v20 = vld [vmem:[%s1803_s8 + $0x38] sm:$0xff] }
 0x1f5   :  { %v1220_v23 = vpop.f32.mrf.mxu1 }
 0x1f6   :  { %v424_v25 = vadd.f32 %v1220_v23, %v1026_v58  ;;  %1245 = vmatprep.mubr.bf16.mxu0 %v461_v21  ;;  %v451_v31 = vmax.f32 %v413_v24, 0.0  ;;  %v824_v21 = vld [vmem:[%s1803_s8 + $0x30] sm:$0xff]  ;;  %v822_v23 = vld [vmem:[%s1803_s8 + $0x20] sm:$0xff]  ;;  %v821_v24 = vld [vmem:[%s1803_s8 + $0x18] sm:$0xff] }
 0x1f7   :  { %v415_v27 = vpop.f32.mrf.mxu1  ;;  %1246 = vmatmul.mubr.bf16.gmra.mxu0 %v462_v22  ;;  %v823_v22 = vld [vmem:[%s1803_s8 + $0x28] sm:$0xff] }
 0x1f8   :  { %v416_v28 = vadd.f32 %v1026_v58, %v415_v27  ;;  %v454_v29 = vmax.f32 %v424_v25, 0.0  ;;  %v820_v25 = vld [vmem:[%s1803_s8 + $0x10] sm:$0xff] }
 0x1f9   :  { %v1223_v30 = vpop.f32.mrf.mxu1 }
 0x1fa   :  { %v452_v32 = vmax.f32 %v416_v28, 0.0  ;;  %v464_v36 = vpack.c.bf16 %v454_v29, %v453_v33  ;;  %v437_v40 = vadd.f32 %v1223_v30, %v1026_v58 }
 0x1fb   :  { %v428_v34 = vpop.f32.mrf.mxu1 }
 0x1fc   :  { %v463_v35 = vpack.c.bf16 %v452_v32, %v451_v31  ;;  %v429_v38 = vadd.f32 %v1026_v58, %v428_v34  ;;  %v457_v53 = vmax.f32 %v437_v40, 0.0  ;;  %v1043_v40 = vld [vmem:[%s1804_s7] ss:$0 sm:$0xff] }
 0x1fd   :  { %v1224_v37 = vpop.f32.mrf.mxu1 }
 0x1fe   :  { %v440_v39 = vadd.f32 %v1224_v37, %v1026_v58  ;;  %1249 = vmatprep.mubr.bf16.mxu0 %v463_v35  ;;  %v455_v44 = vmax.f32 %v429_v38, 0.0 }
 0x1ff   :  { %v431_v41 = vpop.f32.mrf.mxu1  ;;  %1250 = vmatmul.mubr.bf16.gmra.mxu0 %v464_v36 }
 0x200   :  { %v432_v42 = vadd.f32 %v1026_v58, %v431_v41  ;;  %v458_v43 = vmax.f32 %v440_v39, 0.0 }
 0x202   :  { %v456_v45 = vmax.f32 %v432_v42, 0.0  ;;  %v466_v55 = vpack.c.bf16 %v458_v43, %v457_v53 }
 0x204   :  { %v465_v54 = vpack.c.bf16 %v456_v45, %v455_v44 }
 0x206   :  { %1253 = vmatprep.mubr.bf16.mxu0 %v465_v54 }
 0x207   :  { %1254 = vmatmul.mubr.bf16.gmra.mxu0 %v466_v55 }
 0x208   :  { %1321 = vmatprep.mubr.msk.f32.mxu0 %vm1431_vm0, %v1430_v16 }
 0x2af   :  { %v1243_v56 = vpop.f32.mrf.mxu0 }
 0x2b1   :  { %v565_v57 = vpop.f32.mrf.mxu0 }
 0x2b3   :  { %v1244_v59 = vpop.f32.mrf.mxu0 }
 0x2b4   :  { %v629_v14 = vpack.c.bf16 %v1244_v59, %v1243_v56 }
 0x2b5   :  { %v568_v60 = vpop.f32.mrf.mxu0 }
 0x2b6   :  { %v628_v15 = vpack.c.bf16 %v568_v60, %v565_v57 }
 0x2b7   :  { %v1247_v61 = vpop.f32.mrf.mxu0 }
 0x2b9   :  { %v581_v62 = vpop.f32.mrf.mxu0 }
 0x2bb   :  { %v1248_v63 = vpop.f32.mrf.mxu0 }
 0x2bc   :  { %v631_v12 = vpack.c.bf16 %v1248_v63, %v1247_v61 }
 0x2bd   :  { %v584_v0 = vpop.f32.mrf.mxu0 }
 0x2be   :  { %v630_v13 = vpack.c.bf16 %v584_v0, %v581_v62 }
 0x2bf   :  { %v1251_v1 = vpop.f32.mrf.mxu0 }
 0x2c1   :  { %v597_v2 = vpop.f32.mrf.mxu0 }
 0x2c3   :  { %v1252_v3 = vpop.f32.mrf.mxu0 }
 0x2c4   :  { %v633_v10 = vpack.c.bf16 %v1252_v3, %v1251_v1  ;;  %v740_v3 = vld [vmem:[%s1805_s2] sm:$0xff] }
 0x2c5   :  { %v600_v58 = vpop.f32.mrf.mxu0 }
 0x2c6   :  { %v632_v11 = vpack.c.bf16 %v600_v58, %v597_v2  ;;  %v819_v58 = vld [vmem:[%s1803_s8 + $0x8] sm:$0xff] }
 0x2c7   :  { %v1255_v4 = vpop.f32.mrf.mxu0 }
 0x2c9   :  { %v613_v5 = vpop.f32.mrf.mxu0 }
 0x2cb   :  { %v1256_v6 = vpop.f32.mrf.mxu0 }
 0x2cc   :  { %v635_v7 = vpack.c.bf16 %v1256_v6, %v1255_v4  ;;  %v818_v4 = vld [vmem:[%s1803_s8] sm:$0xff]  ;;  %v926_v6 = vld [vmem:[%s1806_s10 + $0x70] sm:$0xff] }
 0x2cd   :  { %v616_v8 = vpop.f32.mrf.mxu0 }
 0x2ce   :  { %v634_v9 = vpack.c.bf16 %v616_v8, %v613_v5  ;;  %1257 = vmatprep.subr.bf16.mxu1 %v635_v7  ;;  %v927_v5 = vld [vmem:[%s1806_s10 + $0x78] sm:$0xff]  ;;  %v924_v8 = vld [vmem:[%s1806_s10 + $0x60] sm:$0xff] }
 0x2cf   :  { %1258 = vmatpush3.bf16.msra.mxu1 %v635_v7  ;;  %v925_v7 = vld [vmem:[%s1806_s10 + $0x68] sm:$0xff] }
 0x2d0   :  { %1259 = vmatprep.subr.bf16.mxu1 %v634_v9 }
 0x2d3   :  { %1260 = vmatpush3.bf16.msra.mxu1 %v634_v9  ;;  %v923_v9 = vld [vmem:[%s1806_s10 + $0x58] sm:$0xff] }
 0x2d4   :  { %1261 = vmatprep.subr.bf16.mxu1 %v633_v10 }
 0x2d7   :  { %1262 = vmatpush3.bf16.msra.mxu1 %v633_v10  ;;  %v922_v10 = vld [vmem:[%s1806_s10 + $0x50] sm:$0xff] }
 0x2d8   :  { %1263 = vmatprep.subr.bf16.mxu1 %v632_v11 }
 0x2db   :  { %1264 = vmatpush3.bf16.msra.mxu1 %v632_v11  ;;  %v921_v11 = vld [vmem:[%s1806_s10 + $0x48] sm:$0xff] }
 0x2dc   :  { %1265 = vmatprep.subr.bf16.mxu1 %v631_v12 }
 0x2df   :  { %1266 = vmatpush3.bf16.msra.mxu1 %v631_v12  ;;  %v920_v12 = vld [vmem:[%s1806_s10 + $0x40] sm:$0xff] }
 0x2e0   :  { %1267 = vmatprep.subr.bf16.mxu1 %v630_v13 }
 0x2e3   :  { %1268 = vmatpush3.bf16.msra.mxu1 %v630_v13  ;;  %v919_v13 = vld [vmem:[%s1806_s10 + $0x38] sm:$0xff] }
 0x2e4   :  { %1269 = vmatprep.subr.bf16.mxu1 %v629_v14 }
 0x2e7   :  { %1270 = vmatpush3.bf16.msra.mxu1 %v629_v14  ;;  %v918_v14 = vld [vmem:[%s1806_s10 + $0x30] sm:$0xff] }
 0x2e8   :  { %1271 = vmatprep.subr.bf16.mxu1 %v628_v15 }
 0x2eb   :  { %1272 = vmatpush3.bf16.msra.mxu1 %v628_v15  ;;  %v917_v15 = vld [vmem:[%s1806_s10 + $0x28] sm:$0xff] }
 0x2ec   :  { %1324 = vmatprep.subr.mxu1 %v1430_v16 }
 0x2ee   :  { %1274 = vmatmul.mubr.bf16.vlgmr.msra.gmra.mxu1 %v1570_v46  ;;  %v1432_v46 = vmov 0  }
 0x2ef   :  { %1277 = vmatprep.mubr.bf16.mxu1 %v1575_v47  ;;  %1397 = vset.pattern.permute.xlu0 %v1432_v46  ;;  %v811_v47 = vld [vmem:[%s1802_s3] sm:$0xff] }
 0x2f0   :  { %814 = vperm.xlu0 %1397, %v811_v47   ;;  %v916_v46 = vld [vmem:[%s1806_s10 + $0x20] sm:$0xff]  ;;  %v915_v47 = vld [vmem:[%s1806_s10 + $0x18] sm:$0xff] }
 0x2f6   :  { %1278 = vmatmul.mubr.bf16.gmra.mxu1 %v1582_v48  ;;  %v833_v48 = vld [vmem:[%s1803_s8 + $0x78] sm:$0xff] }
 0x2f7   :  { %1281 = vmatprep.mubr.bf16.mxu1 %v1587_v49  ;;  %v832_v49 = vld [vmem:[%s1803_s8 + $0x70] sm:$0xff]  ;;  %1325 = vmatpush3.msra.mxu1 %v833_v48 }
 0x2f8   :  { %1326 = vmatprep.subr.mxu1 %v1430_v16 }
 0x2f9   :  { %1327 = vmatpush3.msra.mxu1 %v832_v49 }
 0x2fa   :  { %1328 = vmatprep.subr.mxu1 %v1430_v16 }
 0x2fe   :  { %1282 = vmatmul.mubr.bf16.gmra.mxu1 %v1594_v50  ;;  %v831_v50 = vld [vmem:[%s1803_s8 + $0x68] sm:$0xff] }
 0x2ff   :  { %1285 = vmatprep.mubr.bf16.mxu1 %v1599_v51  ;;  %v830_v51 = vld [vmem:[%s1803_s8 + $0x60] sm:$0xff]  ;;  %1329 = vmatpush3.msra.mxu1 %v831_v50 }
 0x300   :  { %1330 = vmatprep.subr.mxu1 %v1430_v16 }
 0x301   :  { %1331 = vmatpush3.msra.mxu1 %v830_v51 }
 0x302   :  { %1332 = vmatprep.subr.mxu1 %v1430_v16 }
 0x306   :  { %1286 = vmatmul.mubr.bf16.gmra.mxu1 %v1606_v52  ;;  %v829_v52 = vld [vmem:[%s1803_s8 + $0x58] sm:$0xff] }
 0x307   :  { %1356 = vmatprep.mubr.msk.f32.mxu1 %vm1431_vm0, %v1430_v16  ;;  %1333 = vmatpush3.msra.mxu1 %v829_v52  ;;  %v914_v52 = vld [vmem:[%s1806_s10 + $0x10] sm:$0xff] }
 0x308   :  { %1334 = vmatprep.subr.mxu1 %v1430_v16 }
 0x309   :  { %1335 = vmatpush3.msra.mxu1 %v828_v17  ;;  %v913_v17 = vld [vmem:[%s1806_s10 + $0x8] sm:$0xff] }
 0x30a   :  { %1336 = vmatprep.subr.mxu1 %v1430_v16 }
 0x30b   :  { %1337 = vmatpush3.msra.mxu1 %v827_v18  ;;  %v912_v18 = vld [vmem:[%s1806_s10] sm:$0xff] }
 0x30c   :  { %1338 = vmatprep.subr.mxu1 %v1430_v16 }
 0x30d   :  { %1339 = vmatpush3.msra.mxu1 %v826_v19  ;;  %v1044_v19 = vld [vmem:[%s1807_s9] ss:$0 sm:$0xff] }
 0x30e   :  { %1340 = vmatprep.subr.mxu1 %v1430_v16 }
 0x30f   :  { %1341 = vmatpush3.msra.mxu1 %v825_v20 }
 0x310   :  { %1342 = vmatprep.subr.mxu1 %v1430_v16 }
 0x311   :  { %1343 = vmatpush3.msra.mxu1 %v824_v21 }
 0x312   :  { %1344 = vmatprep.subr.mxu1 %v1430_v16 }
 0x313   :  { %1345 = vmatpush3.msra.mxu1 %v823_v22 }
 0x314   :  { %1346 = vmatprep.subr.mxu1 %v1430_v16 }
 0x315   :  { %1347 = vmatpush3.msra.mxu1 %v822_v23 }
 0x316   :  { %1348 = vmatprep.subr.mxu1 %v1430_v16 }
 0x317   :  { %1349 = vmatpush3.msra.mxu1 %v821_v24  ;;  %v1045_v24 = vld [vmem:[%s1808_s11] ss:$0 sm:$0xff] }
 0x318   :  { %1350 = vmatprep.subr.mxu1 %v1430_v16 }
 0x319   :  { %1351 = vmatpush3.msra.mxu1 %v820_v25 }
 0x31a   :  { %1352 = vmatprep.subr.mxu1 %v1430_v16 }
 0x31b   :  { %1353 = vmatpush3.msra.mxu1 %v819_v58 }
 0x31c   :  { %1354 = vmatprep.subr.mxu1 %v1430_v16 }
 0x31d   :  { %1355 = vmatpush3.msra.mxu1 %v818_v4 }
 0x36b   :  { %v815_v48 = vpop.permute.xlu0 %814 }
 0x3ae   :  { %v1275_v26 = vpop.f32.mrf.mxu1 }
 0x3af   :  { %v686_v0 = vadd.f32 %v1275_v26, %v1043_v40 }
 0x3b0   :  { %v677_v27 = vpop.f32.mrf.mxu1 }
 0x3b1   :  { %v678_v2 = vadd.f32 %v1043_v40, %v677_v27 }
 0x3b2   :  { %v1276_v28 = vpop.f32.mrf.mxu1 }
 0x3b3   :  { %v689_v63 = vadd.f32 %v1276_v28, %v1043_v40 }
 0x3b4   :  { %v680_v29 = vpop.f32.mrf.mxu1 }
 0x3b5   :  { %v681_v1 = vadd.f32 %v1043_v40, %v680_v29 }
 0x3b6   :  { %v1279_v30 = vpop.f32.mrf.mxu1 }
 0x3b7   :  { %v702_v60 = vadd.f32 %v1279_v30, %v1043_v40 }
 0x3b8   :  { %v693_v31 = vpop.f32.mrf.mxu1 }
 0x3b9   :  { %v694_v62 = vadd.f32 %v1043_v40, %v693_v31 }
 0x3ba   :  { %v1280_v32 = vpop.f32.mrf.mxu1 }
 0x3bb   :  { %v705_v59 = vadd.f32 %v1280_v32, %v1043_v40 }
 0x3bc   :  { %v696_v33 = vpop.f32.mrf.mxu1 }
 0x3bd   :  { %v697_v61 = vadd.f32 %v1043_v40, %v696_v33 }
 0x3be   :  { %v1283_v34 = vpop.f32.mrf.mxu1 }
 0x3bf   :  { %v718_v55 = vadd.f32 %v1283_v34, %v1043_v40 }
 0x3c0   :  { %v709_v35 = vpop.f32.mrf.mxu1 }
 0x3c1   :  { %v710_v57 = vadd.f32 %v1043_v40, %v709_v35 }
 0x3c2   :  { %v1284_v36 = vpop.f32.mrf.mxu1 }
 0x3c3   :  { %v721_v54 = vadd.f32 %v1284_v36, %v1043_v40 }
 0x3c4   :  { %v712_v37 = vpop.f32.mrf.mxu1 }
 0x3c5   :  { %v713_v56 = vadd.f32 %v1043_v40, %v712_v37 }
 0x3c6   :  { %v1287_v38 = vpop.f32.mrf.mxu1 }
 0x3c7   :  { %v734_v44 = vadd.f32 %v1287_v38, %v1043_v40 }
 0x3c8   :  { %v725_v39 = vpop.f32.mrf.mxu1 }
 0x3c9   :  { %v726_v53 = vadd.f32 %v1043_v40, %v725_v39 }
 0x3ca   :  { %v1288_v41 = vpop.f32.mrf.mxu1 }
 0x3cb   :  { %v737_v42 = vadd.f32 %v1288_v41, %v1043_v40 }
 0x3cc   :  { %v728_v43 = vpop.f32.mrf.mxu1 }
 0x3cd   :  { %1290 = vmatpush3.msra.mxu0 %v737_v42  ;;  %v729_v45 = vadd.f32 %v1043_v40, %v728_v43 }
 0x3ce   :  { %1291 = vmatprep.subr.mxu0 %v1430_v16 }
 0x3cf   :  { %1292 = vmatpush3.msra.mxu0 %v734_v44 }
 0x3d0   :  { %1293 = vmatprep.subr.mxu0 %v1430_v16 }
 0x3d1   :  { %1294 = vmatpush3.msra.mxu0 %v729_v45 }
 0x3d2   :  { %1295 = vmatprep.subr.mxu0 %v1430_v16 }
 0x3d3   :  { %1296 = vmatpush3.msra.mxu0 %v726_v53 }
 0x3d4   :  { %1297 = vmatprep.subr.mxu0 %v1430_v16 }
 0x3d5   :  { %1298 = vmatpush3.msra.mxu0 %v721_v54 }
 0x3d6   :  { %1299 = vmatprep.subr.mxu0 %v1430_v16 }
 0x3d7   :  { %1300 = vmatpush3.msra.mxu0 %v718_v55 }
 0x3d8   :  { %1301 = vmatprep.subr.mxu0 %v1430_v16 }
 0x3d9   :  { %1302 = vmatpush3.msra.mxu0 %v713_v56 }
 0x3da   :  { %1303 = vmatprep.subr.mxu0 %v1430_v16 }
 0x3db   :  { %1304 = vmatpush3.msra.mxu0 %v710_v57 }
 0x3dc   :  { %1305 = vmatprep.subr.mxu0 %v1430_v16 }
 0x3dd   :  { %1306 = vmatpush3.msra.mxu0 %v705_v59 }
 0x3de   :  { %1307 = vmatprep.subr.mxu0 %v1430_v16 }
 0x3df   :  { %1308 = vmatpush3.msra.mxu0 %v702_v60 }
 0x3e0   :  { %1309 = vmatprep.subr.mxu0 %v1430_v16 }
 0x3e1   :  { %1310 = vmatpush3.msra.mxu0 %v697_v61 }
 0x3e2   :  { %1311 = vmatprep.subr.mxu0 %v1430_v16 }
 0x3e3   :  { %1312 = vmatpush3.msra.mxu0 %v694_v62 }
 0x3e4   :  { %1313 = vmatprep.subr.mxu0 %v1430_v16 }
 0x3e5   :  { %1314 = vmatpush3.msra.mxu0 %v689_v63 }
 0x3e6   :  { %1315 = vmatprep.subr.mxu0 %v1430_v16 }
 0x3e7   :  { %1316 = vmatpush3.msra.mxu0 %v686_v0 }
 0x3e8   :  { %1317 = vmatprep.subr.mxu0 %v1430_v16 }
 0x3e9   :  { %1318 = vmatpush3.msra.mxu0 %v681_v1 }
 0x3ea   :  { %1319 = vmatprep.subr.mxu0 %v1430_v16 }
 0x3eb   :  { %1320 = vmatpush3.msra.mxu0 %v678_v2 }
 0x3ec   :  { %1322 = vmatmul.mubr.f32.vlgmr.msra.gmra.mxu0 %v740_v3  ;;  %1359 = vmatprep.subr.mxu0 %v1430_v16 }
 0x3ed   :  { %1391 = vmatprep.mubr.msk.f32.mxu0 %vm1431_vm0, %v1430_v16  ;;  %1360 = vmatpush3.msra.mxu0 %v927_v5 }
 0x3ee   :  { %1361 = vmatprep.subr.mxu0 %v1430_v16 }
 0x3ef   :  { %1362 = vmatpush3.msra.mxu0 %v926_v6 }
 0x3f0   :  { %1363 = vmatprep.subr.mxu0 %v1430_v16 }
 0x3f1   :  { %1364 = vmatpush3.msra.mxu0 %v925_v7 }
 0x3f2   :  { %1365 = vmatprep.subr.mxu0 %v1430_v16 }
 0x3f3   :  { %1366 = vmatpush3.msra.mxu0 %v924_v8 }
 0x3f4   :  { %1367 = vmatprep.subr.mxu0 %v1430_v16 }
 0x3f5   :  { %1368 = vmatpush3.msra.mxu0 %v923_v9 }
 0x3f6   :  { %1369 = vmatprep.subr.mxu0 %v1430_v16 }
 0x3f7   :  { %1370 = vmatpush3.msra.mxu0 %v922_v10 }
 0x3f8   :  { %1371 = vmatprep.subr.mxu0 %v1430_v16 }
 0x3f9   :  { %1372 = vmatpush3.msra.mxu0 %v921_v11 }
 0x3fa   :  { %1373 = vmatprep.subr.mxu0 %v1430_v16 }
 0x3fb   :  { %1374 = vmatpush3.msra.mxu0 %v920_v12 }
 0x3fc   :  { %1375 = vmatprep.subr.mxu0 %v1430_v16 }
 0x3fd   :  { %1376 = vmatpush3.msra.mxu0 %v919_v13 }
 0x3fe   :  { %1377 = vmatprep.subr.mxu0 %v1430_v16 }
 0x3ff   :  { %1378 = vmatpush3.msra.mxu0 %v918_v14 }
 0x400   :  { %1379 = vmatprep.subr.mxu0 %v1430_v16 }
 0x401   :  { %1380 = vmatpush3.msra.mxu0 %v917_v15 }
 0x402   :  { %1381 = vmatprep.subr.mxu0 %v1430_v16 }
 0x403   :  { %1382 = vmatpush3.msra.mxu0 %v916_v46 }
 0x404   :  { %1383 = vmatprep.subr.mxu0 %v1430_v16 }
 0x405   :  { %1384 = vmatpush3.msra.mxu0 %v915_v47 }
 0x406   :  { %1385 = vmatprep.subr.mxu0 %v1430_v16 }
 0x407   :  { %1386 = vmatpush3.msra.mxu0 %v914_v52 }
 0x408   :  { %1387 = vmatprep.subr.mxu0 %v1430_v16 }
 0x409   :  { %1388 = vmatpush3.msra.mxu0 %v913_v17 }
 0x40a   :  { %1389 = vmatprep.subr.mxu0 %v1430_v16 }
 0x40b   :  { %1390 = vmatpush3.msra.mxu0 %v912_v18 }
 0x4ac   :  { %v807_v49 = vpop.f32.mrf.mxu0 }
 0x4ad   :  { %v817_v50 = vmul.f32 %v815_v48, %v807_v49 }
 0x4ae   :  { %v1323_v51 = vpop.f32.mrf.mxu0 }
 0x4af   :  { %1357 = vmatmul.mubr.f32.vlgmr.msra.gmra.mxu1 %v817_v50 }
 0x56f   :  { %v907_v20 = vpop.f32.mrf.mxu1 }
 0x570   :  { %v908_v21 = vadd.f32 %v1044_v19, %v907_v20 }
 0x571   :  { %v1358_v22 = vpop.f32.mrf.mxu1 }
 0x572   :  { %v911_v23 = vmax.f32 %v908_v21, 0.0 }
 0x574   :  { %1392 = vmatmul.mubr.f32.vlgmr.msra.gmra.mxu0 %v911_v23 }
 0x634   :  { %v1001_v25 = vpop.f32.mrf.mxu0 }
 0x635   :  { %v1002_v16 = vadd.f32 %v1045_v24, %v1001_v25 }
 0x636   :  { %v1393_v26 = vpop.f32.mrf.mxu0 }
 0x637   :  { %1005 = vst [vmem:[%s1809_s12] sm:$0xff] %v1002_v16 }

</bundles_post_ra>
